<compile_context>
chip_gen: v7x
topology: tpu7x:2x2x1
jax: 0.10.0
libtpu: 0.0.40
codegen_flags: <defaults>
</compile_context>

<pallas_src>
import functools

import jax
import jax.numpy as jnp
from jax import lax
from jax.experimental import pallas as pl
from jax.experimental.pallas import tpu as pltpu

_LANE = 128


def _vmem_capacity_bytes():
    """Physical per-core VMEM; conservative 64 MiB (v7x-sized) fallback."""
    try:
        return int(pltpu.get_tpu_info().vmem_capacity_bytes)
    except Exception:
        return 64 * 1024 * 1024


# --------------------------------------------------------------------------
# Kernels
# --------------------------------------------------------------------------
def _energy_partial_kernel(x_ref, epart_ref, acc_ref, *, tn, kn_s, n_total,
                           needs_mask, compute_dtype):
    """Phase 1: per-(batch, split) partial energy  E_part += X_tile @ X_tile^T."""
    kk = pl.program_id(2)

    @pl.when(kk == 0)
    def _():
        acc_ref[...] = jnp.zeros_like(acc_ref)

    x = x_ref[0]                                       # (C, TN), input dtype
    if needs_mask:
        # Ragged last tile / overshoot tiles of the megacore split: zero the
        # invalid columns (boundary-block reads contain garbage; zero columns
        # contribute nothing to X @ X^T).
        start = (pl.program_id(1) * kn_s + kk) * tn
        col = lax.broadcasted_iota(jnp.int32, x.shape, 1)
        x = jnp.where(col < (n_total - start), x, jnp.zeros_like(x))

    xc = x.astype(compute_dtype)
    # Contract the N axis of both operands -> (C, C); no explicit X^T copy.
    acc_ref[...] += lax.dot_general(
        xc, xc,
        dimension_numbers=(((1,), (1,)), ((), ())),
        preferred_element_type=jnp.float32)

    @pl.when(kk == kn_s - 1)
    def _():
        epart_ref[0, 0] = acc_ref[...]


def _softmax_finalize_kernel(gamma_ref, epart_ref, attn_ref):
    """Reduce split partials, exact softmax(-E), fold gamma into attention."""
    e = jnp.sum(epart_ref[0], axis=0)                  # (S, C, C) f32 -> (C, C)
    # softmax(rowmax(E) - E) == softmax(-E); stable form via rowmin(E).
    m = jnp.min(e, axis=-1, keepdims=True)
    p = jnp.exp(m - e)                                 # arguments <= 0
    denom = jnp.sum(p, axis=-1, keepdims=True)
    attn_ref[0] = (gamma_ref[0] * (p / denom)).astype(attn_ref.dtype)


def _apply_kernel(attn_ref, x_ref, o_ref, *, compute_dtype):
    """Phase 2: y_tile = (gamma*attn) @ X_tile + X_tile  (gamma pre-folded)."""
    x = x_ref[0]                                       # (C, TN)
    attn = attn_ref[0].astype(compute_dtype)           # (C, C), stored f32
    out = jnp.dot(attn, x.astype(compute_dtype),
                  preferred_element_type=jnp.float32)
    o_ref[0] = (out + x.astype(jnp.float32)).astype(o_ref.dtype)


def _fused_kernel(gamma_ref, x_ref, o_ref, *, compute_dtype):
    """Fused single pass per batch: X is read from HBM once, y written once."""
    x = x_ref[0]                                       # (C, N)
    xc = x.astype(compute_dtype)
    energy = lax.dot_general(
        xc, xc,
        dimension_numbers=(((1,), (1,)), ((), ())),
        preferred_element_type=jnp.float32)
    m = jnp.min(energy, axis=-1, keepdims=True)
    p = jnp.exp(m - energy)
    denom = jnp.sum(p, axis=-1, keepdims=True)
    attn = (gamma_ref[0] * (p / denom)).astype(compute_dtype)
    out = jnp.dot(attn, xc, preferred_element_type=jnp.float32)
    o_ref[0] = (out + x.astype(jnp.float32)).astype(o_ref.dtype)


# --------------------------------------------------------------------------
# Wrapper
# --------------------------------------------------------------------------
def cam_module(x, gamma, *, tn_target=None, allow_fused=True,
               use_bf16_matmul=False):
    """x: (B, C, H, W); gamma: shape-(1,) (or scalar) parameter."""
    B, C, H, W = x.shape
    N = H * W
    dtype = x.dtype
    itemsize = jnp.dtype(dtype).itemsize
    compute_dtype = jnp.bfloat16 if use_bf16_matmul else dtype
    cd_size = jnp.dtype(compute_dtype).itemsize

    x3 = x.reshape(B, C, N)                   # row-major, same as torch .view
    gamma32 = jnp.asarray(gamma, jnp.float32).reshape((1,))

    vmem_cap = _vmem_capacity_bytes()
    # Never request the entire physical VMEM (v7x only has 64 MiB per core).
    vmem_ceiling = (vmem_cap * 3) // 4

    # ---------------- fused single-pass path (per-batch slab resident) -----
    fused_bytes = (C * N * (4 * itemsize + 8)          # 2x in + 2x out (dbl buf) + f32 temps
                   + (C * N * cd_size if compute_dtype != dtype else 0)
                   + 4 * C * C * 4 + (2 << 20))
    if allow_fused and fused_bytes <= (7 * vmem_cap) // 10:
        y3 = pl.pallas_call(
            functools.partial(_fused_kernel, compute_dtype=compute_dtype),
            out_shape=jax.ShapeDtypeStruct((B, C, N), dtype),
            grid_spec=pltpu.PrefetchScalarGridSpec(
                num_scalar_prefetch=0,
                grid=(B,),
                in_specs=[
                    pl.BlockSpec(memory_space=pltpu.MemorySpace.SMEM),  # gamma
                    pl.BlockSpec((1, C, N), lambda b: (b, 0, 0)),
                ],
                out_specs=pl.BlockSpec((1, C, N), lambda b: (b, 0, 0)),
            ),
            compiler_params=pltpu.CompilerParams(
                dimension_semantics=("parallel",),
                vmem_limit_bytes=int(min(vmem_ceiling,
                                         max(3 * fused_bytes // 2, 16 << 20))),
            ),
        )(gamma32, x3)
        return y3.reshape(B, C, H, W)

    # ---------------- two-phase fallback (large per-batch slabs) -----------
    if tn_target is None:
        # 128-MiB-VMEM parts (v5e/v6e) can afford much larger spatial tiles.
        tn_target = 4096 if vmem_cap >= (96 << 20) else 1024
    budget = min(32 << 20, vmem_cap // 4)
    per_col = C * (4 * itemsize + 8 +
                   (cd_size if compute_dtype != dtype else 0))
    tn_cap = max(_LANE, (budget // max(per_col, 1)) // _LANE * _LANE)
    tn_pick = max(_LANE, (int(min(tn_cap, tn_target)) // _LANE) * _LANE)

    if N <= tn_pick:
        TN, Kn, ragged = N, 1, False          # single full-width block
    else:
        TN = tn_pick                          # lane-aligned streamed tiles
        Kn = pl.cdiv(N, TN)
        ragged = (N % TN) != 0

    # Megacore: with B == 1 only the batch axis would be "parallel" and the
    # second TensorCore would idle through the whole energy accumulation, so
    # split the N-tile loop into S per-core partial accumulators.
    S = 2 if (B == 1 and Kn >= 2) else 1
    Kn_s = pl.cdiv(Kn, S)
    needs_mask = ragged or (S * Kn_s != Kn)

    est1 = 2 * C * TN * itemsize + C * TN * (cd_size + 4) + 6 * C * C * 4
    est2 = 4 * C * TN * itemsize + C * TN * 8 + 4 * C * C * 4
    vmem_limit = int(min(vmem_ceiling, max(2 * max(est1, est2), 16 << 20)))

    # Phase 1: partial energies (B, S, C, C) accumulated in f32 VMEM scratch.
    epart = pl.pallas_call(
        functools.partial(_energy_partial_kernel, tn=TN, kn_s=Kn_s, n_total=N,
                          needs_mask=needs_mask, compute_dtype=compute_dtype),
        out_shape=jax.ShapeDtypeStruct((B, S, C, C), jnp.float32),
        grid_spec=pltpu.PrefetchScalarGridSpec(
            num_scalar_prefetch=0,
            grid=(B, S, Kn_s),
            in_specs=[pl.BlockSpec(
                (1, C, TN),
                lambda b, s, kk: (b, 0, jnp.minimum(s * Kn_s + kk, Kn - 1)))],
            out_specs=pl.BlockSpec((1, 1, C, C), lambda b, s, kk: (b, s, 0, 0)),
            scratch_shapes=[pltpu.VMEM((C, C), jnp.float32)],
        ),
        compiler_params=pltpu.CompilerParams(
            dimension_semantics=("parallel", "parallel", "arbitrary"),
            vmem_limit_bytes=vmem_limit,
        ),
    )(x3)

    # Reduce split partials + exact softmax + gamma fold -> attention (f32).
    attn = pl.pallas_call(
        _softmax_finalize_kernel,
        out_shape=jax.ShapeDtypeStruct((B, C, C), jnp.float32),
        grid_spec=pltpu.PrefetchScalarGridSpec(
            num_scalar_prefetch=0,
            grid=(B,),
            in_specs=[
                pl.BlockSpec(memory_space=pltpu.MemorySpace.SMEM),   # gamma
                pl.BlockSpec((1, S, C, C), lambda b: (b, 0, 0, 0)),
            ],
            out_specs=pl.BlockSpec((1, C, C), lambda b: (b, 0, 0)),
        ),
        compiler_params=pltpu.CompilerParams(
            dimension_semantics=("parallel",)),
    )(gamma32, epart)

    # Phase 2: y = (gamma*attn) @ X + X, fully parallel over (B, N tiles).
    y3 = pl.pallas_call(
        functools.partial(_apply_kernel, compute_dtype=compute_dtype),
        out_shape=jax.ShapeDtypeStruct((B, C, N), dtype),
        grid_spec=pltpu.PrefetchScalarGridSpec(
            num_scalar_prefetch=0,
            grid=(B, Kn),
            in_specs=[
                pl.BlockSpec((1, C, C), lambda b, k: (b, 0, 0)),   # attention
                pl.BlockSpec((1, C, TN), lambda b, k: (b, 0, k)),  # x tile
            ],
            out_specs=pl.BlockSpec((1, C, TN), lambda b, k: (b, 0, k)),
        ),
        compiler_params=pltpu.CompilerParams(
            dimension_semantics=("parallel", "parallel"),
            vmem_limit_bytes=vmem_limit,
        ),
    )(attn, x3)
    return y3.reshape(B, C, H, W)


# --------------------------------------------------------------------------
# Reference & tests
# --------------------------------------------------------------------------
def _reference(x, gamma):
    """Pure-JAX reference of the CAM forward (f32, highest matmul precision)."""
    B, C, H, W = x.shape
    q = x.reshape(B, C, -1).astype(jnp.float32)
    energy = jnp.einsum("bcn,bdn->bcd", q, q, precision=lax.Precision.HIGHEST)
    e_new = jnp.max(energy, axis=-1, keepdims=True) - energy
    attn = jax.nn.softmax(e_new, axis=-1)
    out = jnp.einsum("bcd,bdn->bcn", attn, q,
                     precision=lax.Precision.HIGHEST).reshape(B, C, H, W)
    return gamma.reshape(-1)[0] * out + x.astype(jnp.float32)


if __name__ == "__main__":
    key = jax.random.PRNGKey(0)
    B, C, H, W = 2, 4, 16, 16
    x = jax.random.normal(key, (B, C, H, W), dtype=jnp.float32)

    # Module init: gamma = zeros(1) -> y == x (fused path).
    gamma0 = jnp.zeros((1,), dtype=jnp.float32)
    y0 = cam_module(x, gamma0)
    jax.block_until_ready(y0)
    assert jnp.allclose(y0, _reference(x, gamma0), atol=1e-5, rtol=1e-5)

    gamma = jnp.array([0.5], dtype=jnp.float32)
    y_ref = _reference(x, gamma)

    # Fused single-pass path (per-batch slab resident in VMEM).
    y1 = cam_module(x, gamma)
    jax.block_until_ready(y1)
    assert jnp.allclose(y1, y_ref, atol=1e-3, rtol=1e-3)

    # Two-phase path: multi-tile energy accumulation along N (Kn >= 2, S = 1).
    y2 = cam_module(x, gamma, allow_fused=False, tn_target=128)
    jax.block_until_ready(y2)
    assert jnp.allclose(y2, y_ref, atol=1e-3, rtol=1e-3)

    # B == 1: megacore split of the energy accumulation (S = 2) with an odd
    # tile count (overshoot tiles masked) and a ragged last tile (N = 360).
    x1 = jax.random.normal(jax.random.PRNGKey(1), (1, 4, 10, 36),
                           dtype=jnp.float32)
    y3 = cam_module(x1, gamma, allow_fused=False, tn_target=128)
    jax.block_until_ready(y3)
    assert jnp.allclose(y3, _reference(x1, gamma), atol=1e-3, rtol=1e-3)

    # Non-lane-aligned N handled with no jnp.pad / output slice (N = 120).
    x_odd = jax.random.normal(jax.random.PRNGKey(2), (1, 4, 10, 12),
                              dtype=jnp.float32)
    y4 = cam_module(x_odd, gamma)
    jax.block_until_ready(y4)
    assert jnp.allclose(y4, _reference(x_odd, gamma), atol=1e-3, rtol=1e-3)

    # Reduced-precision MXU path (v5e / f32-fed v6e knob): smoke test only.
    y5 = cam_module(x, gamma, use_bf16_matmul=True)
    jax.block_until_ready(y5)
    assert y5.shape == x.shape and bool(jnp.all(jnp.isfinite(y5)))

    print("KERNEL_OK")
</pallas_src>

<mosaic_0001>
module attributes {stable_mosaic.version = 11 : i64} {
  func.func @_fused_kernel(%arg0: i32, %arg1: memref<1xf32, #tpu.memory_space<smem>>, %arg2: memref<1x4x256xf32, #tpu.memory_space<vmem>>, %arg3: memref<1x4x256xf32, #tpu.memory_space<vmem>>) attributes {dimension_semantics = [#tpu.dimension_semantics<parallel>], iteration_bounds = array<i64: 2>, scalar_prefetch = 0 : i64, scratch_operands = 0 : i64, tpu.core_type = #tpu.core_type<tc>, window_params = [{transform_indices = @transform_0, window_bounds = array<i64: 1>}, {transform_indices = @transform_1, window_bounds = array<i64: 1, 4, 256>}, {transform_indices = @transform_2, window_bounds = array<i64: 1, 4, 256>}]} {
    %c0 = arith.constant 0 : index
    %c0_0 = arith.constant 0 : index
    %c0_1 = arith.constant 0 : index
    %0 = vector.load %arg2[%c0, %c0_0, %c0_1] : memref<1x4x256xf32, #tpu.memory_space<vmem>>, vector<1x4x256xf32>
    %1 = vector.shape_cast %0 : vector<1x4x256xf32> to vector<4x256xf32>
    %cst = arith.constant dense<0.000000e+00> : vector<4x4xf32>
    %2 = tpu.matmul %1, %1, %cst {dimension_numbers = #tpu.dot_dimension_numbers<[1], [1], [0], [0], [0, 0, 1, 0], [], []>} : vector<4x256xf32>, vector<4x256xf32>, vector<4x4xf32> -> vector<4x4xf32>
    %cst_2 = arith.constant dense<0x7F800000> : vector<4xf32>
    %3 = vector.multi_reduction <minimumf>, %2, %cst_2 [1] : vector<4x4xf32> to vector<4xf32>
    %4 = vector.shape_cast %3 : vector<4xf32> to vector<4x1xf32>
    %5 = vector.broadcast %4 : vector<4x1xf32> to vector<4x4xf32>
    %6 = arith.subf %5, %2 : vector<4x4xf32>
    %7 = math.exp %6 : vector<4x4xf32>
    %cst_3 = arith.constant dense<0.000000e+00> : vector<4xf32>
    %8 = vector.multi_reduction <add>, %7, %cst_3 [1] : vector<4x4xf32> to vector<4xf32>
    %9 = vector.shape_cast %8 : vector<4xf32> to vector<4x1xf32>
    %c0_4 = arith.constant 0 : index
    %10 = memref.load %arg1[%c0_4] : memref<1xf32, #tpu.memory_space<smem>>
    %11 = vector.broadcast %9 : vector<4x1xf32> to vector<4x4xf32>
    %12 = arith.divf %7, %11 : vector<4x4xf32>
    %13 = vector.broadcast %10 : f32 to vector<4x4xf32>
    %14 = arith.mulf %13, %12 : vector<4x4xf32>
    %cst_5 = arith.constant dense<0.000000e+00> : vector<4x256xf32>
    %15 = tpu.matmul %14, %1, %cst_5 {dimension_numbers = #tpu.dot_dimension_numbers<[1], [0], [0], [1], [0, 0, 1, 1], [], []>} : vector<4x4xf32>, vector<4x256xf32>, vector<4x256xf32> -> vector<4x256xf32>
    %16 = arith.addf %15, %1 : vector<4x256xf32>
    %c0_6 = arith.constant 0 : index
    %c0_7 = arith.constant 0 : index
    %c0_8 = arith.constant 0 : index
    %17 = vector.load %arg3[%c0_6, %c0_7, %c0_8] : memref<1x4x256xf32, #tpu.memory_space<vmem>>, vector<1x4x256xf32>
    %18 = vector.shape_cast %17 : vector<1x4x256xf32> to vector<4x256xf32>
    %19 = vector.shape_cast %16 : vector<4x256xf32> to vector<1x4x256xf32>
    tpu.vector_store %arg3[%c0_6, %c0_7, %c0_8], %19 {strides = array<i32>} : memref<1x4x256xf32, #tpu.memory_space<vmem>>, vector<1x4x256xf32>,
    return
  }
  func.func @transform_0(%arg0: i32) -> i32 {
    %c0_i32 = arith.constant 0 : i32
    %c0_i32_0 = arith.constant 0 : i32
    return %c0_i32 : i32
  }
  func.func @transform_1(%arg0: i32) -> (i32, i32, i32) {
    %c0_i32 = arith.constant 0 : i32
    %c0_i32_0 = arith.constant 0 : i32
    %c0_i32_1 = arith.constant 0 : i32
    return %arg0, %c0_i32, %c0_i32_0 : i32, i32, i32
  }
  func.func @transform_2(%arg0: i32) -> (i32, i32, i32) {
    %c0_i32 = arith.constant 0 : i32
    %c0_i32_0 = arith.constant 0 : i32
    %c0_i32_1 = arith.constant 0 : i32
    return %arg0, %c0_i32, %c0_i32_0 : i32, i32, i32
  }
}

</mosaic_0001>

<bundles_post_ra>
// kernel: tpu_custom_call.1
= control target key start
LH: loop header
LB: loop body
LE: loop exit
PB: predicated region body
PF: predicated region fallthrough
CT: control target
= control target key end

     0   :  { %s775_s0 = inlined_call_operand.<no memory space> [shape: f32[1], index: 0, kind: input, shape index: {}]   ;;  %s776_s1 = inlined_call_operand.hbm [shape: f32[2,4,256], index: 1, kind: input, shape index: {}]   ;;  %s777_s2 = inlined_call_operand.hbm [shape: f32[2,4,256], index: 2, kind: output, shape index: {}]  }
   0x1   :  { %7 = sst [smem:[#allocation2]] %s775_s0 }
   0x2   :  { %8 = vsyncpa [#allocation4], 0 }
   0x3   :  { %10 = vsyncpa [#allocation4 + $0x1], 0 }
   0x4   :  { %11 = vsyncpa [#allocation5], 0 }
   0x5   :  { %13 = vsyncpa [#allocation5 + $0x1], 0  ;;  %s610_s11 = smov 0   ;;  %s612_s12 = smov 0  }
   0x6   :  { %s614_s13 = smov 0   ;;  %s616_s14 = smov 0  }
   0x7 LB: > { %s631_s0 = sadd.s32 4294967295, %s587_s14   ;;  %s420_s15 = sadd.s32 4294967294, %s587_s14   ;;  %s587_s14 = sphi %s616_s14, %s792_s14   ;;  %s583_s13 = sphi %s614_s13, %s791_s13   ;;  %s579_s12 = sphi %s612_s12, %s790_s12   ;;  %s575_s11 = sphi %s610_s11, %s789_s11  }
   0x8   : > { %s635_s16 = sadd.s32 1, %s587_s14   ;;  %s47_s17 = sadd.s32 1, %s583_s13 }
   0x9   : > { %s44_s18 = ssub.s32 %s587_s14, %s635_s16  ;;  %p54_p0 = scmp.ne.s32.totalorder %s583_s13, %s579_s12 }
   0xa   : > { %p45_p1 = scmp.eq.s32.totalorder %s44_s18, 0  ;;  %p55_p2 = scmp.eq.s32.totalorder %s587_s14, 0 }
   0xb   : > { %p60_p3 = scmp.ne.s32.totalorder %s579_s12, %s575_s11  ;;  %p61_p4 = scmp.eq.s32.totalorder %s631_s0, 0 }
   0xc   : > { %s647_s19 = scalar_select %p45_p1, %s583_s13, %s47_s17  }
   0xd   : > { %p649_p5 = por %p55_p2, %p54_p0  ;;  %p653_p6 = por %p61_p4, %p60_p3 }
   0xe   : > { %p84_p7 = scmp.eq.s32.totalorder %s631_s0, 1  ;;  %p90_p8 = scmp.eq.s32.totalorder %s420_s15, 1 }
   0xf   : > { %p451_p10 = scmp.lt.s32.totalorder %s587_s14, 2  ;;  %s113_s24 = sand.u32 1, %s583_s13  }
  0x10   : > { %p660_p11 = por %p84_p7, %p54_p0  ;;  %p664_p12 = por %p90_p8, %p60_p3 }
  0x11   : > { %s437_s25 = sshll.u32 %s587_s14, 7  ;;  %s423_s26 = sshll.u32 %s113_s24, 3 }
  0x12   : > { %s781_s22 = scalar_select %p660_p11, 1, 0 }
  0x13   : > { %s782_s23 = scalar_select %p664_p12, 1, 0 }
  0x14   : > { %s673_s29 = scalar_lea.hbm %s776_s1, %s437_s25  ;;  %s117_s30 = scalar_lea.vmem [#allocation3], %s423_s26 }
  0x15   : > { %s125_s3 = sshll.u32 %s117_s30, 4  ;;  %p677_p13 = pnand %p451_p10, %p649_p5  ;;  %s681_s3 = int_to_ptr.vmem [resolvable:$true] %s125_s3 }
  0x16   : > { %s114_s5 = scalar_lea.sflag [#allocation4], %s113_s24  ;;  %s491_s6 = scalar_lea.hbm %s673_s29, 128 }
  0x17   : > { %p492_p2 = scmp.ne.s32.totalorder %s673_s29, %s491_s6  ;;  %p493_p3 = pneg %p677_p13 }
  0x18   : > { %s496_s9 = scalar_lea.hbm %s776_s1, 256  ;;  %p497_p5 = scmp.lt.u32.totalorder %s673_s29, %s776_s1 }
  0x19   : > { %p494_p4 = pnand %p493_p3, %p492_p2  ;;  %p498_p8 = scmp.lt.u32.totalorder %s496_s9, %s491_s6 }
  0x1a   : > { %p500_p9 = scmp.lt.u32.totalorder %s491_s6, %s673_s29 }
  0x1b   : > { %p495_p7 = pneg %p494_p4  ;;  %p499_p10 = por %p498_p8, %p497_p5 }
  0x1d   : > { %p501_p0 = por %p500_p9, %p499_p10 }
  0x1f   : > { %p502_p1 = pnand %p501_p0, %p495_p7 }
  0x21   : > { %505 = shalt.err (!%p502_p1)
}
  0x22   : > { %s506_s17 = scalar_lea.vmem %s681_s3, 128  ;;  %s589_s18 = smov [#allocation3]  }
  0x23   : > { %p507_p2 = scmp.ne.s32.totalorder %s681_s3, %s506_s17  ;;  %s511_s20 = sshll.u32 %s589_s18, 4  ;;  %s512_s20 = int_to_ptr.vmem [resolvable:$false] %s511_s20 }
  0x24   : > { %s513_s24 = scalar_lea.vmem %s512_s20, 256  ;;  %p514_p11 = scmp.lt.s32.totalorder %s681_s3, %s512_s20 }
  0x25   : > { %p509_p4 = pnand %p507_p2, %p493_p3  ;;  %p515_p5 = scmp.lt.s32.totalorder %s513_s24, %s506_s17 }
  0x27   : > { %p510_p12 = pneg %p509_p4  ;;  %p516_p8 = por %p515_p5, %p514_p11 }
  0x29   : > { %p517_p9 = pnand %p516_p8, %p510_p12 }
  0x2b   : > { %520 = shalt.err (!%p517_p9)
}
  0x2c   : > { %446 = dma.hbm_to_vmem [thread:$0]  (!%p677_p13), %s673_s29, 128, %s681_s3, %s114_s5  }
  0x2d   : > { %p784_p0 = scmp.lt.s32.totalorder %s587_s14, 3  ;;  %p785_p1 = scmp.ge.s32.totalorder %s587_s14, 1 }
  0x2f   : > { %p131_p3 = pnand %p785_p1, %p784_p0 }
  0x30   : > { %s715_s25 = sand.u32 (!%p131_p3), 1, %s579_s12  }
  0x31   : > { %134 = sbr.rel (%p131_p3) target bundleno = 823 (0x337), region = 28  ;;  %s427_s26 = sshll.u32 (!%p131_p3), %s715_s25, 3 }
  0x32   : > { %s137_s27 = scalar_lea.sflag (!%p131_p3), [#allocation4], %s715_s25  ;;  %s140_s28 = scalar_lea.vmem (!%p131_p3), [#allocation3], %s427_s26 }
  0x38   : > { %566 = dma.done.wait (%p653_p6), %s137_s27, 128  }
  0x39   : > { %568 = vsyncadd (%p653_p6), %s137_s27, 4294967168  ;;  %v161_v0 = vld [vmem:[%s140_s28] sm:$0xff]  ;;  %vm235_vm0 = vcmask 27648   ;;  %vm254_vm1 = vcmask 1043456   ;;  %v590_v10 = vmov 0.0   ;;  %s245_s21 = sld [smem:[#allocation2]] }
  0x3a   : > { %v163_v1 = vcombine.high %v161_v0, %v161_v0  ;;  %323 = vmatprep.mubr.f32.mxu1 %v590_v10  ;;  %vm250_vm2 = vcmask 31744   ;;  %s438_s29 = sshll.u32 %s631_s0, 7  ;;  %s160_s30 = scalar_lea.vmem [#allocation6], %s427_s26 }
  0x3b   : > { %s350_s3 = sshll.u32 %s160_s30, 4  ;;  %s731_s6 = scalar_lea.hbm %s777_s2, %s438_s29  ;;  %s733_s3 = int_to_ptr.vmem [resolvable:$true] %s350_s3 }
  0x3c   : > { %165 = vmatprep.subr.mxu0 %v163_v1  ;;  %229 = vmatprep.mubr.f32.mxu0 %v163_v1  ;;  %s336_s7 = scalar_lea.sflag [#allocation5], %s715_s25  ;;  %s521_s8 = scalar_lea.vmem %s733_s3, 128 }
  0x3d   : > { %166 = vmatpush1.xpose.msra.mxu0 %v161_v0  ;;  %429 = vmatprep.subr.msk.mxu1 %vm254_vm1, %v163_v1  ;;  %p522_p6 = scmp.ne.s32.totalorder %s733_s3, %s521_s8  ;;  %p786_p11 = scmp.ne.s32.totalorder %s781_s22, 0 }
  0x3e   : > { %430 = vmatpush1.msk.msra.mxu1 %vm254_vm1, %v161_v0  ;;  %s591_s0 = smov [#allocation6]  }
  0x3f   : > { %v248_v13 = vstv %s245_s21  ;;  %p523_p12 = pnand %p522_p6, %p786_p11  ;;  %s525_s9 = sshll.u32 %s591_s0, 4  ;;  %s526_s9 = int_to_ptr.vmem [resolvable:$false] %s525_s9 }
  0x40   : > { %230 = vmatmul.mubr.f32.vlgmr.msra.gmra.mrb[0].mxu0 %v161_v0  ;;  %s527_s10 = scalar_lea.vmem %s526_s9, 256  ;;  %p528_p7 = scmp.lt.s32.totalorder %s733_s3, %s526_s9 }
  0x41   : > { %p524_p13 = pneg %p523_p12  ;;  %p529_p10 = scmp.lt.s32.totalorder %s527_s10, %s521_s8 }
  0x43   : > { %p530_p2 = por %p529_p10, %p528_p7 }
  0x45   : > { %p531_p4 = pnand %p530_p2, %p524_p13 }
 0x113   : > { %v231_v2 = vpop.f32.mrb[0].mxu0 }
 0x114   : > { %v233_v3 = vpop.f32.mrb[1].mxu0  ;;  %v236_v4 = vsel %vm235_vm0, %v231_v2, inf }
 0x115   : > { %237 = vmin.xlane.f32.xlu0 %v236_v4 }
 0x1a2   : > { %v238_v5 = vpop.xlane.xlu0 %237 }
 0x1a3   : > { %v239_v6 = vsub.f32 %v238_v5, %v231_v2 }
 0x1a5   : > { %v240_v7 = vmul.f32 1.442695, %v239_v6 }
 0x1a7   : > { %487 = vpow2.f32 %v240_v7 }
 0x1b1   : > { %v488_v8 = vpop.eup %487 }
 0x1b2   : > { %v242_v9 = vsel %vm235_vm0, %v488_v8, 0.0 }
 0x1b3   : > { %243 = vadd.xlane.f32.xlu0 %v242_v9 }
 0x240   : > { %v244_v11 = vpop.xlane.xlu0 %243 }
 0x241   : > { %489 = vrcp.f32 %v244_v11 }
 0x24b   : > { %v490_v12 = vpop.eup %489 }
 0x24c   : > { %v247_v14 = vmul.f32 %v490_v12, %v488_v8 }
 0x24e   : > { %v249_v15 = vmul.f32 %v248_v13, %v247_v14 }
 0x250   : > { %431 = vmatmul.mubr.msk.f32.vlgmr.msra.gmra.mrb[0].mxu1 %vm250_vm2, %v249_v15 }
 0x323   : > { %v325_v16 = vpop.f32.mrb[0].mxu1 }
 0x324   : > { %v326_v17 = vadd.f32 %v325_v16, %v161_v0  ;;  %v327_v18 = vpop.f32.mrb[1].mxu1 }
 0x325   : > { %v328_v19 = vadd.f32 %v327_v18, %v163_v1 }
 0x327   : > { %v332_v20 = vcombine.low %v326_v17, %v328_v19 }
 0x329   : > { %334 = vst [vmem:[%s160_s30] sm:$0xff] %v332_v20 }
 0x32a   : > { %534 = shalt.err (!%p531_p4)
}
 0x32b   : > { %s535_s15 = scalar_lea.hbm %s731_s6, 128  ;;  %s539_s20 = scalar_lea.hbm %s777_s2, 256 }
 0x32c   : > { %p536_p5 = scmp.ne.s32.totalorder %s731_s6, %s535_s15  ;;  %p540_p0 = scmp.lt.u32.totalorder %s731_s6, %s777_s2 }
 0x32d   : > { %p541_p1 = scmp.lt.u32.totalorder %s539_s20, %s535_s15  ;;  %p543_p6 = scmp.lt.u32.totalorder %s535_s15, %s731_s6 }
 0x32e   : > { %p537_p8 = pnand %p536_p5, %p786_p11 }
 0x32f   : > { %p542_p3 = por %p541_p1, %p540_p0 }
 0x330   : > { %p538_p9 = pneg %p537_p8 }
 0x331   : > { %p544_p12 = por %p543_p6, %p542_p3 }
 0x333   : > { %p545_p13 = pnand %p544_p12, %p538_p9 }
 0x335   : > { %548 = shalt.err (!%p545_p13)
}
 0x336   : > { %441 = dma.vmem_to_hbm [thread:$0]  (%p786_p11), %s733_s3, 128, %s731_s6, %s336_s7  }
 0x337 PF: > { %s362_s26 = sand.u32 1, %s575_s11   ;;  %p787_p7 = scmp.ne.s32.totalorder %s782_s23, 0 }
 0x338   : > { %p788_p10 = scmp.ge.s32.totalorder %s587_s14, 2  ;;  %s363_s27 = scalar_lea.sflag [#allocation5], %s362_s26 }
 0x33a   : > { %p448_p2 = pnand %p788_p10, %p787_p7 }
 0x33c   : > { %570 = dma.done.wait (!%p448_p2), %s363_s27, 128  }
 0x33d   : > { %572 = vsyncadd (!%p448_p2), %s363_s27, 4294967168  ;;  %p16_p4 = scmp.ge.s32.totalorder %s635_s16, 4   ;;  %s789_s11 = smov %s579_s12 }
 0x33e   : > { %s790_s12 = smov %s583_s13  ;;  %s791_s13 = smov %s647_s19 }
 0x33f   : > { %s792_s14 = smov %s635_s16  ;;  %18 = sbr.rel (!%p16_p4) target bundleno = 7 (0x7), region = 73 }
 0x346   :  { %368 = vsyncpa [#allocation4], 1 }
 0x347   :  { %370 = vsyncpa [#allocation4 + $0x1], 1 }
 0x348   :  { %371 = vsyncpa [#allocation5], 1 }
 0x349   :  { %373 = vsyncpa [#allocation5 + $0x1], 1 }

</bundles_post_ra>
